<compile_context>
chip_gen: v7x
topology: tpu7x:2x2x1
jax: 0.10.0
libtpu: 0.0.40
codegen_flags: <defaults>
</compile_context>

<pallas_src>
import math
import functools

import jax
import jax.numpy as jnp
from jax.experimental import pallas as pl
from jax.experimental.pallas import tpu as pltpu


def _compiler_params():
    """dimension_semantics=('parallel','parallel'): megacore sharding on v7x, no-op on v5e/v6e."""
    cls = getattr(pltpu, "CompilerParams", None)
    if cls is None:  # very old jax fallback
        cls = getattr(pltpu, "TPUCompilerParams", None)
    if cls is None:
        return None
    return cls(dimension_semantics=("parallel", "parallel"))


def _choose_blocks(num_rows: int, num_cols: int, itemsize: int):
    """Pick (block_rows, block_cols) obeying the (8,128) rule, targeting ~2 MiB tiles."""
    # lane axis: full extent if small, else a lane-dense multiple of 128
    if num_cols <= 8192:
        block_cols = num_cols
    else:
        block_cols = 8192
    target_elems = (2 * 1024 * 1024) // itemsize  # ~2 MiB per streamed tile
    rows_budget = max(1, target_elems // block_cols)
    if num_rows <= rows_budget:
        block_rows = num_rows            # full extent -> always legal
    else:
        block_rows = max(8, (rows_budget // 8) * 8)  # multiple of 8
    return block_rows, block_cols


def _pos_enc_dropout_kernel(seed_ref, x_ref, pe_ref, o_ref, *, p: float):
    """One (block_rows, block_cols) tile: out = dropout(x + pe)."""
    # x_ref: (bb, bl), pe_ref: (1, bl) broadcast over rows, seed_ref: (1,) int32 in SMEM
    y = x_ref[...] + pe_ref[...]

    if p > 0.0:
        bb, bl = x_ref.shape
        j = pl.program_id(0)  # column-block axis (outer)
        i = pl.program_id(1)  # row-block axis (inner)

        # Global element coordinates for this tile (unique across the whole grid).
        rows = jax.lax.broadcasted_iota(jnp.uint32, (bb, bl), 0)
        cols = jax.lax.broadcasted_iota(jnp.uint32, (bb, bl), 1)
        g_row = rows + (i * bb).astype(jnp.uint32)
        g_col = cols + (j * bl).astype(jnp.uint32)
        seed = seed_ref[0].astype(jnp.uint32)

        # Counter-hash PRNG (splitmix-style finalizer) -> 32 uniform bits / element.
        h = g_row * jnp.uint32(0x9E3779B1) + g_col
        h = h ^ (seed * jnp.uint32(0x85EBCA6B) + jnp.uint32(0xC2B2AE35))
        h = h ^ (h >> 16)
        h = h * jnp.uint32(0x7FEB352D)
        h = h ^ (h >> 15)
        h = h * jnp.uint32(0x846CA68B)
        h = h ^ (h >> 16)

        # Integer-threshold Bernoulli(p) mask: no f32 uniform materialization.
        r31 = (h & jnp.uint32(0x7FFFFFFF)).astype(jnp.int32)
        thresh = jnp.int32(min(int(round(p * float(1 << 31))), (1 << 31) - 1))
        keep = r31 >= thresh

        scale = jnp.asarray(1.0 / (1.0 - p), dtype=y.dtype)
        y = jnp.where(keep, y * scale, jnp.zeros_like(y))

    o_ref[...] = y.astype(o_ref.dtype)


def positional_encoding_forward(x, pe_full, *, dropout_p: float, seed: int, training: bool = True):
    """x: (B, S, D); pe_full: (max_seq_len, D). Returns dropout(x + pe[:S]) with shape (B, S, D)."""
    B, S, D = x.shape
    L = S * D
    # Glue: slice to actual seq length, keep compute in x.dtype (bf16 stays bf16 on v6e/v7x),
    # and flatten to a lane-dense (B, S*D) layout.
    pe = pe_full[:S, :].astype(x.dtype).reshape(1, L)
    x2 = x.reshape(B, L)
    p = float(dropout_p) if training else 0.0

    block_b, block_l = _choose_blocks(B, L, jnp.dtype(x.dtype).itemsize)
    # Grid order: column blocks outer, row blocks inner -> pe block (depends only on the
    # column block) stays resident across the inner row sweep, no redundant DMA.
    grid = (pl.cdiv(L, block_l), pl.cdiv(B, block_b))

    kernel = functools.partial(_pos_enc_dropout_kernel, p=p)
    seed_arr = jnp.array([seed], dtype=jnp.int32)

    grid_spec = pltpu.PrefetchScalarGridSpec(
        num_scalar_prefetch=1,  # seed lands in SMEM before the grid runs
        grid=grid,
        in_specs=[
            pl.BlockSpec((block_b, block_l), lambda j, i, seed_ref: (i, j)),  # x tile
            pl.BlockSpec((1, block_l), lambda j, i, seed_ref: (0, j)),        # pe row block
        ],
        out_specs=pl.BlockSpec((block_b, block_l), lambda j, i, seed_ref: (i, j)),
    )

    out = pl.pallas_call(
        kernel,
        out_shape=jax.ShapeDtypeStruct((B, L), x.dtype),
        grid_spec=grid_spec,
        compiler_params=_compiler_params(),
    )(seed_arr, x2, pe)
    return out.reshape(B, S, D)


def make_sinusoidal_pe(seq_len: int, d_model: int) -> jnp.ndarray:
    """Deterministic buffer construction, identical to the PyTorch __init__."""
    position = jnp.arange(seq_len, dtype=jnp.float32)[:, None]            # (S, 1)
    div_term = jnp.exp(
        jnp.arange(0, d_model, 2, dtype=jnp.float32) * (-math.log(10000.0) / d_model)
    )                                                                      # (D/2,)
    pe = jnp.zeros((seq_len, d_model), dtype=jnp.float32)
    pe = pe.at[:, 0::2].set(jnp.sin(position * div_term))
    pe = pe.at[:, 1::2].set(jnp.cos(position * div_term))
    return pe


if __name__ == "__main__":
    # small shapes consistent with the module: batch=2, seq=8, d_model=32
    batch, seq_len, d_model = 2, 8, 32
    max_seq_len = 16
    dropout_p = 0.1

    key = jax.random.PRNGKey(0)
    x = jax.random.normal(key, (batch, seq_len, d_model), dtype=jnp.float32)

    pe_full = make_sinusoidal_pe(max_seq_len, d_model)

    # 1) eval-mode (dropout disabled) -> must match x + pe exactly
    out_eval = positional_encoding_forward(
        x, pe_full, dropout_p=dropout_p, seed=0, training=False
    )
    out_eval = jax.block_until_ready(out_eval)
    ref = x + pe_full[None, :seq_len, :]
    assert jnp.allclose(out_eval, ref, atol=1e-6), "eval-mode mismatch vs reference"

    # 2) training-mode dropout (stochastic mask, inverted scaling)
    out_train = positional_encoding_forward(
        x, pe_full, dropout_p=dropout_p, seed=1234, training=True
    )
    out_train = jax.block_until_ready(out_train)
    assert out_train.shape == x.shape and out_train.dtype == x.dtype
    # every surviving element equals ref / (1 - p); dropped elements are exactly 0
    kept = out_train != 0.0
    assert jnp.allclose(
        jnp.where(kept, out_train, 0.0),
        jnp.where(kept, ref / (1.0 - dropout_p), 0.0),
        atol=1e-5,
    ), "train-mode surviving elements not scaled correctly"

    print("KERNEL_OK")
</pallas_src>

<mosaic_0001>
module attributes {stable_mosaic.version = 11 : i64} {
  func.func @_pos_enc_dropout_kernel(%arg0: i32, %arg1: i32, %arg2: memref<1xi32, #tpu.memory_space<smem>>, %arg3: memref<2x256xf32, #tpu.memory_space<vmem>>, %arg4: memref<1x256xf32, #tpu.memory_space<vmem>>, %arg5: memref<2x256xf32, #tpu.memory_space<vmem>>) attributes {dimension_semantics = [#tpu.dimension_semantics<parallel>, #tpu.dimension_semantics<parallel>], iteration_bounds = array<i64: 1, 1>, scalar_prefetch = 1 : i64, scratch_operands = 0 : i64, tpu.core_type = #tpu.core_type<tc>, window_params = [{transform_indices = @transform_0, window_bounds = array<i64: 2, 256>}, {transform_indices = @transform_1, window_bounds = array<i64: 1, 256>}, {transform_indices = @transform_2, window_bounds = array<i64: 2, 256>}]} {
    %c0 = arith.constant 0 : index
    %c0_0 = arith.constant 0 : index
    %0 = vector.load %arg3[%c0, %c0_0] : memref<2x256xf32, #tpu.memory_space<vmem>>, vector<2x256xf32>
    %c0_1 = arith.constant 0 : index
    %c0_2 = arith.constant 0 : index
    %1 = vector.load %arg4[%c0_1, %c0_2] : memref<1x256xf32, #tpu.memory_space<vmem>>, vector<1x256xf32>
    %2 = vector.broadcast %1 : vector<1x256xf32> to vector<2x256xf32>
    %3 = arith.addf %0, %2 : vector<2x256xf32>
    %c0_3 = arith.constant 0 : index
    %c0_4 = arith.constant 0 : index
    %4 = vector.load %arg5[%c0_3, %c0_4] : memref<2x256xf32, #tpu.memory_space<vmem>>, vector<2x256xf32>
    tpu.vector_store %arg5[%c0_3, %c0_4], %3 {strides = array<i32>} : memref<2x256xf32, #tpu.memory_space<vmem>>, vector<2x256xf32>,
    return
  }
  func.func @transform_0(%arg0: i32, %arg1: i32, %arg2: memref<1xi32, #tpu.memory_space<smem>>) -> (i32, i32) {
    %c0_i32 = arith.constant 0 : i32
    return %arg1, %arg0 : i32, i32
  }
  func.func @transform_1(%arg0: i32, %arg1: i32, %arg2: memref<1xi32, #tpu.memory_space<smem>>) -> (i32, i32) {
    %c0_i32 = arith.constant 0 : i32
    %c0_i32_0 = arith.constant 0 : i32
    return %c0_i32, %arg0 : i32, i32
  }
  func.func @transform_2(%arg0: i32, %arg1: i32, %arg2: memref<1xi32, #tpu.memory_space<smem>>) -> (i32, i32) {
    %c0_i32 = arith.constant 0 : i32
    return %arg1, %arg0 : i32, i32
  }
}

</mosaic_0001>

<bundles_post_ra>
// kernel: tpu_custom_call.1
= control target key start
LH: loop header
LB: loop body
LE: loop exit
PB: predicated region body
PF: predicated region fallthrough
CT: control target
= control target key end

     0   :  { %9 = vsyncpa [#allocation5], 0  ;;  %s164_s0 = inlined_call_operand.<no memory space> [shape: s32[1], index: 0, kind: input, shape index: {}]   ;;  %s165_s1 = inlined_call_operand.hbm [shape: f32[2,256], index: 1, kind: input, shape index: {}]   ;;  %s166_s2 = inlined_call_operand.vmem [shape: f32[1,256], index: 2, kind: input, shape index: {}]   ;;  %s167_s3 = inlined_call_operand.hbm [shape: f32[2,256], index: 3, kind: output, shape index: {}]  }
   0x1   :  { %10 = vsyncpa [#allocation6], 0  ;;  %s114_s12 = smov [#allocation4]   ;;  %s66_s16 = scalar_lea.hbm %s165_s1, 64 }
   0x2   :  { %s17_s13 = sshll.u32 %s114_s12, 4  ;;  %p67_p0 = scmp.ne.s32.totalorder %s165_s1, %s66_s16  ;;  %s18_s13 = int_to_ptr.vmem [resolvable:$true] %s17_s13 }
   0x3   :  { %p70_p1 = scmp.lt.u32.totalorder %s66_s16, %s165_s1 }
   0x5   :  { %p72_p2 = pnand %p70_p1, %p67_p0 }
   0x7   :  { %75 = shalt.err (!%p72_p2)
}
   0x8   :  { %s76_s20 = scalar_lea.vmem %s18_s13, 64  ;;  %p81_p4 = scmp.lt.s32.totalorder %s18_s13, %s18_s13 }
   0x9   :  { %p77_p3 = scmp.ne.s32.totalorder %s18_s13, %s76_s20  ;;  %p82_p5 = scmp.lt.s32.totalorder %s76_s20, %s76_s20 }
   0xb   :  { %p83_p6 = por %p82_p5, %p81_p4 }
   0xd   :  { %p84_p7 = pnand %p83_p6, %p77_p3 }
   0xf   :  { %87 = shalt.err (!%p84_p7)
}
  0x10   :  { %20 = dma.hbm_to_vmem [thread:$0]  %s165_s1, 64, %s18_s13, [#allocation5]  }
  0x11   :  { %110 = dma.done.wait [#allocation5], 64  }
  0x12   :  { %111 = vsyncadd [#allocation5], 4294967232  ;;  %v29_v0 = vlaneseq  ;;  %v115_v1 = vmov 1983009808   ;;  %v27_v7 = vld [vmem:[%s166_s2] sm:$0x3] }
  0x13   :  { %v39_v2 = vunpack.c.l.s4 %v115_v1  ;;  %v26_v12 = vld [vmem:[#allocation4] sm:$0xf]  ;;  %s116_s25 = smov [#allocation7]  }
  0x14   :  { %v30_v3 = vshrl.u32 %v29_v0, 7  ;;  %s54_s1 = sshll.u32 %s116_s25, 4  ;;  %s55_s1 = int_to_ptr.vmem [resolvable:$true] %s54_s1 }
  0x15   :  { %v40_v6 = vunpack.c.0.s8 %v39_v2  ;;  %s88_s26 = scalar_lea.vmem %s55_s1, 64  ;;  %p93_p9 = scmp.lt.s32.totalorder %s55_s1, %s55_s1 }
  0x16   :  { %v31_v4 = vsub.s32 0, %v30_v3  ;;  %v35_v5 = vsub.s32 1, %v30_v3  ;;  %p89_p8 = scmp.ne.s32.totalorder %s55_s1, %s88_s26  ;;  %p94_p10 = scmp.lt.s32.totalorder %s88_s26, %s88_s26 }
  0x17   :  { %v43_v10 = vsub.s32 %v40_v6, %v30_v3 }
  0x18   :  { %v32_v8 = vrot.slane %v27_v7, %v31_v4  ;;  %v36_v9 = vrot.slane %v27_v7, %v35_v5  ;;  %p95_p11 = por %p94_p10, %p93_p9 }
  0x1a   :  { %v37_v11 = vcombine.low %v32_v8, %v36_v9  ;;  %p96_p12 = pnand %p95_p11, %p89_p8 }
  0x1c   :  { %v44_v13 = vrot.slane %v37_v11, %v43_v10 }
  0x1e   :  { %v46_v14 = vadd.f32 %v44_v13, %v26_v12 }
  0x20   :  { %47 = vst [vmem:[#allocation7] sm:$0xf] %v46_v14 }
  0x21   :  { %99 = shalt.err (!%p96_p12)
}
  0x22   :  { %s100_s28 = scalar_lea.hbm %s167_s3, 64 }
  0x23   :  { %p101_p13 = scmp.ne.s32.totalorder %s167_s3, %s100_s28  ;;  %p104_p0 = scmp.lt.u32.totalorder %s100_s28, %s167_s3 }
  0x25   :  { %p106_p1 = pnand %p104_p0, %p101_p13 }
  0x27   :  { %109 = shalt.err (!%p106_p1)
}
  0x28   :  { %57 = dma.vmem_to_hbm [thread:$0]  %s55_s1, 64, %s167_s3, [#allocation6]  }
  0x29   :  { %112 = dma.done.wait [#allocation6], 64  }
  0x2a   :  { %113 = vsyncadd [#allocation6], 4294967232 }
  0x2b   :  { %61 = vsyncpa [#allocation5], 1 }
  0x2c   :  { %62 = vsyncpa [#allocation6], 1 }

</bundles_post_ra>
